<compile_context>
chip_gen: v5e
topology: v5e:2x2
jax: 0.10.0
libtpu: 0.0.40
codegen_flags: <defaults>
</compile_context>

<pallas_src>
import jax
import jax.numpy as jnp
from jax import lax
from jax.experimental import pallas as pl
from jax.experimental.pallas import tpu as pltpu

LN_EPS = 1e-5
_MIB = 1024 * 1024


def _round_up(x, m):
    return ((x + m - 1) // m) * m


def _vmem_capacity_bytes():
    try:
        return int(pltpu.get_tpu_info().vmem_capacity_bytes)
    except Exception:
        return 64 * _MIB  # conservative fallback (v7x per-TC VMEM)


def _pick_tn(v, tn_req):
    """Pick a lane-dense (multiple-of-128) vocab tile.

    Prefers a divisor of V so the weight/output never need padding.
    Returns (tn, padded_V)."""
    tn_req = max(128, tn_req)
    if v % 128 == 0:
        best = 128
        d = 128
        upper = min(v, tn_req)
        while d <= upper:
            if v % d == 0:
                best = d
            d += 128
        return best, v
    # Ragged vocab: pad up to a multiple of tn.
    tn = min(tn_req, _round_up(v, 128))
    return tn, _round_up(v, tn)


def _layernorm_kernel(x_ref, gamma_ref, beta_ref, o_ref):
    # x_ref: (tm, H) input rows; gamma/beta: (1, H); o_ref: (tm, H) in the
    # weight dtype. Stats are computed in f32 on the VPU.
    x = x_ref[...].astype(jnp.float32)
    mean = jnp.mean(x, axis=-1, keepdims=True)
    xc = x - mean
    var = jnp.mean(xc * xc, axis=-1, keepdims=True)
    inv = lax.rsqrt(var + LN_EPS)
    g = gamma_ref[...].astype(jnp.float32)
    b = beta_ref[...].astype(jnp.float32)
    o_ref[...] = (xc * inv * g + b).astype(o_ref.dtype)


def _matmul_kernel(xn_ref, w_ref, o_ref):
    # xn_ref: (tm, H) normalized activations (weight dtype),
    # w_ref:  (H, tn) weight tile (resident across the inner row axis),
    # o_ref:  (tm, tn) logits tile. MXU matmul with f32 accumulation.
    o_ref[...] = jnp.dot(
        xn_ref[...], w_ref[...], preferred_element_type=jnp.float32
    ).astype(o_ref.dtype)


def classification_head(x, gamma, beta, w_t, *, tm=256, tn=2048, out_dtype=None):
    """x: (B, S, H), gamma/beta: (H,), w_t: (H, V) pre-transposed weight.

    Computes linear(ln_f(x)) with linear.weight == w_t.T (no bias).
    Returns logits of shape (B, S, V).
    """
    B, S, H = x.shape
    Hw, V = w_t.shape
    assert Hw == H, (Hw, H)
    M = B * S
    if out_dtype is None:
        out_dtype = x.dtype

    x_bytes = jnp.dtype(x.dtype).itemsize
    w_bytes = jnp.dtype(w_t.dtype).itemsize
    o_bytes = jnp.dtype(out_dtype).itemsize

    # ---------------- tile plan ----------------
    tm = _round_up(min(tm, _round_up(M, 8)), 8)
    tn, Vp = _pick_tn(V, tn)

    vmem_cap = _vmem_capacity_bytes()
    budget = int(0.85 * vmem_cap)    # planning budget
    hard_cap = int(0.90 * vmem_cap)  # never request more than this

    def mm_est(tm_, tn_):
        # double-buffered xn / W / out tiles for the matmul stage
        return 2 * (tm_ * H * w_bytes + H * tn_ * w_bytes + tm_ * tn_ * o_bytes)

    # Shrink tn first (tm=256 is already MXU-friendly), then tm, until it fits.
    while mm_est(tm, tn) > budget and tn > 128:
        tn, Vp = _pick_tn(V, max(128, tn // 2))
    while mm_est(tm, tn) > budget and tm > 8:
        tm = max(8, _round_up(tm // 2, 8))

    Mp = _round_up(M, tm)
    nm = Mp // tm
    nv = Vp // tn

    # ---------------- data prep (pads only when shapes demand it) -------------
    x2d = x.reshape(M, H)
    if Mp != M:
        x2d = jnp.pad(x2d, ((0, Mp - M), (0, 0)))
    w_p = w_t if Vp == V else jnp.pad(w_t, ((0, 0), (0, Vp - V)))
    gamma2d = gamma.reshape(1, H)
    beta2d = beta.reshape(1, H)

    # ---------------- stage 1: LayerNorm once per row -------------------------
    ln_est = 2 * (tm * H * x_bytes + tm * H * w_bytes) + 8 * H * x_bytes
    ln_vmem = int(min(hard_cap, max(3 * ln_est, 32 * _MIB)))
    xn = pl.pallas_call(
        _layernorm_kernel,
        out_shape=jax.ShapeDtypeStruct((Mp, H), w_p.dtype),
        grid_spec=pltpu.PrefetchScalarGridSpec(
            num_scalar_prefetch=0,
            grid=(nm,),
            in_specs=[
                pl.BlockSpec((tm, H), lambda i: (i, 0)),
                pl.BlockSpec((1, H), lambda i: (0, 0)),
                pl.BlockSpec((1, H), lambda i: (0, 0)),
            ],
            out_specs=pl.BlockSpec((tm, H), lambda i: (i, 0)),
        ),
        compiler_params=pltpu.CompilerParams(
            dimension_semantics=("parallel",),
            vmem_limit_bytes=ln_vmem,
        ),
    )(x2d, gamma2d, beta2d)

    # ---------------- stage 2: weight-stationary matmul -----------------------
    mm_vmem = int(min(hard_cap, max(int(1.25 * mm_est(tm, tn)), 32 * _MIB)))
    out2d = pl.pallas_call(
        _matmul_kernel,
        out_shape=jax.ShapeDtypeStruct((Mp, Vp), out_dtype),
        grid_spec=pltpu.PrefetchScalarGridSpec(
            num_scalar_prefetch=0,
            # vocab outer (j): "parallel" -> on v7x megacore shards the vocab
            # axis so each (H, tn) weight tile is fetched once per chip; the
            # inner row axis (i) streams xn tiles past the resident weight.
            grid=(nv, nm),
            in_specs=[
                pl.BlockSpec((tm, H), lambda j, i: (i, 0)),   # xn rows
                pl.BlockSpec((H, tn), lambda j, i: (0, j)),   # W (const along i)
            ],
            out_specs=pl.BlockSpec((tm, tn), lambda j, i: (i, j)),
        ),
        compiler_params=pltpu.CompilerParams(
            dimension_semantics=("parallel", "arbitrary"),
            vmem_limit_bytes=mm_vmem,
        ),
    )(xn, w_p)

    if Mp != M or Vp != V:
        out2d = out2d[:M, :V]
    return out2d.reshape(B, S, V)


def _reference(x, gamma, beta, w_t, out_dtype):
    x32 = x.astype(jnp.float32)
    mean = jnp.mean(x32, axis=-1, keepdims=True)
    var = jnp.mean((x32 - mean) ** 2, axis=-1, keepdims=True)
    xn = (x32 - mean) * lax.rsqrt(var + LN_EPS) * gamma.astype(
        jnp.float32
    ) + beta.astype(jnp.float32)
    out = jnp.einsum(
        "bsh,hv->bsv",
        xn.astype(w_t.dtype),
        w_t,
        preferred_element_type=jnp.float32,
    )
    return out.astype(out_dtype)


if __name__ == "__main__":
    # Small shapes consistent with the module: batch=2, seq=8, hidden=32, vocab=128
    B, S, H, V = 2, 8, 32, 128

    key = jax.random.PRNGKey(0)
    kx, kw, kg, kb = jax.random.split(key, 4)

    x = jax.random.normal(kx, (B, S, H), dtype=jnp.float32)

    # LayerNorm affine params (random to exercise the affine path).
    gamma = 1.0 + 0.1 * jax.random.normal(kg, (H,), dtype=jnp.float32)
    beta = 0.1 * jax.random.normal(kb, (H,), dtype=jnp.float32)

    # Linear weight: torch default uniform(-1/sqrt(H), 1/sqrt(H)), no bias.
    bound = 1.0 / jnp.sqrt(jnp.float32(H))
    w_torch = jax.random.uniform(
        kw, (V, H), dtype=jnp.float32, minval=-bound, maxval=bound
    )
    # Store the weight pre-transposed (H, V) in bf16 for the MXU-native path.
    w_t = w_torch.T.astype(jnp.bfloat16)

    out = classification_head(x, gamma, beta, w_t)
    jax.block_until_ready(out)

    ref = _reference(x, gamma, beta, w_t, out.dtype)
    assert out.shape == (B, S, V), out.shape
    # bf16 matmul path -> bf16-level tolerance vs. the reference.
    assert jnp.allclose(
        out.astype(jnp.float32), ref.astype(jnp.float32), atol=2e-2, rtol=2e-2
    ), "mismatch vs reference"

    print("KERNEL_OK")
</pallas_src>

<mosaic_0001>
module attributes {stable_mosaic.version = 11 : i64} {
  func.func @_layernorm_kernel(%arg0: i32, %arg1: memref<16x32xf32, #tpu.memory_space<vmem>>, %arg2: memref<1x32xf32, #tpu.memory_space<vmem>>, %arg3: memref<1x32xf32, #tpu.memory_space<vmem>>, %arg4: memref<16x32xbf16, #tpu.memory_space<vmem>>) attributes {dimension_semantics = [#tpu.dimension_semantics<parallel>], iteration_bounds = array<i64: 1>, scalar_prefetch = 0 : i64, scratch_operands = 0 : i64, tpu.core_type = #tpu.core_type<tc>, window_params = [{transform_indices = @transform_0, window_bounds = array<i64: 16, 32>}, {pipeline_mode = #tpu.pipeline_mode<synchronous>, transform_indices = @transform_1, window_bounds = array<i64: 1, 32>}, {pipeline_mode = #tpu.pipeline_mode<synchronous>, transform_indices = @transform_2, window_bounds = array<i64: 1, 32>}, {transform_indices = @transform_3, window_bounds = array<i64: 16, 32>}]} {
    %c0 = arith.constant 0 : index
    %c0_0 = arith.constant 0 : index
    %0 = vector.load %arg1[%c0, %c0_0] : memref<16x32xf32, #tpu.memory_space<vmem>>, vector<16x32xf32>
    %cst = arith.constant dense<0.000000e+00> : vector<16xf32>
    %1 = vector.multi_reduction <add>, %0, %cst [1] : vector<16x32xf32> to vector<16xf32>
    %2 = vector.shape_cast %1 : vector<16xf32> to vector<16x1xf32>
    %cst_1 = arith.constant 3.200000e+01 : f32
    %3 = vector.broadcast %cst_1 : f32 to vector<16x1xf32>
    %4 = arith.divf %2, %3 : vector<16x1xf32>
    %5 = vector.broadcast %4 : vector<16x1xf32> to vector<16x32xf32>
    %6 = arith.subf %0, %5 : vector<16x32xf32>
    %7 = arith.mulf %6, %6 : vector<16x32xf32>
    %cst_2 = arith.constant dense<0.000000e+00> : vector<16xf32>
    %8 = vector.multi_reduction <add>, %7, %cst_2 [1] : vector<16x32xf32> to vector<16xf32>
    %9 = vector.shape_cast %8 : vector<16xf32> to vector<16x1xf32>
    %cst_3 = arith.constant 3.200000e+01 : f32
    %10 = vector.broadcast %cst_3 : f32 to vector<16x1xf32>
    %11 = arith.divf %9, %10 : vector<16x1xf32>
    %cst_4 = arith.constant 9.99999974E-6 : f32
    %12 = vector.broadcast %cst_4 : f32 to vector<16x1xf32>
    %13 = arith.addf %11, %12 : vector<16x1xf32>
    %14 = math.rsqrt %13 : vector<16x1xf32>
    %c0_5 = arith.constant 0 : index
    %c0_6 = arith.constant 0 : index
    %15 = vector.load %arg2[%c0_5, %c0_6] : memref<1x32xf32, #tpu.memory_space<vmem>>, vector<1x32xf32>
    %c0_7 = arith.constant 0 : index
    %c0_8 = arith.constant 0 : index
    %16 = vector.load %arg3[%c0_7, %c0_8] : memref<1x32xf32, #tpu.memory_space<vmem>>, vector<1x32xf32>
    %17 = vector.broadcast %14 : vector<16x1xf32> to vector<16x32xf32>
    %18 = arith.mulf %6, %17 : vector<16x32xf32>
    %19 = vector.broadcast %15 : vector<1x32xf32> to vector<16x32xf32>
    %20 = arith.mulf %18, %19 : vector<16x32xf32>
    %21 = vector.broadcast %16 : vector<1x32xf32> to vector<16x32xf32>
    %22 = arith.addf %20, %21 : vector<16x32xf32>
    %23 = arith.truncf %22 : vector<16x32xf32> to vector<16x32xbf16>
    %c0_9 = arith.constant 0 : index
    %c0_10 = arith.constant 0 : index
    %24 = vector.load %arg4[%c0_9, %c0_10] : memref<16x32xbf16, #tpu.memory_space<vmem>>, vector<16x32xbf16>
    tpu.vector_store %arg4[%c0_9, %c0_10], %23 {strides = array<i32>} : memref<16x32xbf16, #tpu.memory_space<vmem>>, vector<16x32xbf16>,
    return
  }
  func.func @transform_0(%arg0: i32) -> (i32, i32) {
    %c0_i32 = arith.constant 0 : i32
    %c0_i32_0 = arith.constant 0 : i32
    return %arg0, %c0_i32 : i32, i32
  }
  func.func @transform_1(%arg0: i32) -> (i32, i32) {
    %c0_i32 = arith.constant 0 : i32
    %c0_i32_0 = arith.constant 0 : i32
    %c0_i32_1 = arith.constant 0 : i32
    return %c0_i32, %c0_i32_0 : i32, i32
  }
  func.func @transform_2(%arg0: i32) -> (i32, i32) {
    %c0_i32 = arith.constant 0 : i32
    %c0_i32_0 = arith.constant 0 : i32
    %c0_i32_1 = arith.constant 0 : i32
    return %c0_i32, %c0_i32_0 : i32, i32
  }
  func.func @transform_3(%arg0: i32) -> (i32, i32) {
    %c0_i32 = arith.constant 0 : i32
    %c0_i32_0 = arith.constant 0 : i32
    return %arg0, %c0_i32 : i32, i32
  }
}

</mosaic_0001>

<bundles_post_ra>
// kernel: tpu_custom_call.1
= control target key start
LH: loop header
LB: loop body
LE: loop exit
PB: predicated region body
PF: predicated region fallthrough
CT: control target
= control target key end

     0   :  { %8 = vsyncpa [#allocation3], 0  ;;  %s274_s0 = inlined_call_operand.hbm [shape: f32[16,32], index: 0, kind: input, shape index: {}]   ;;  %s275_s1 = inlined_call_operand.hbm [shape: f32[1,32], index: 1, kind: input, shape index: {}]   ;;  %s276_s2 = inlined_call_operand.vmem [shape: f32[1,32], index: 2, kind: input, shape index: {}]   ;;  %s277_s3 = inlined_call_operand.hbm [shape: bf16[16,32], index: 3, kind: output, shape index: {}]  }
   0x1   :  { %9 = vsyncpa [#allocation6], 0 }
   0x2   :  { %10 = vsyncpa [#allocation4], 0  ;;  %s15_s14 = sshll.u32 %s274_s0, 4  ;;  %s230_s15 = smov [#allocation2]   ;;  %s16_s14 = int_to_ptr.hbm [resolvable:$true] %s15_s14 }
   0x3   :  { %s17_s16 = sshll.u32 %s230_s15, 4  ;;  %s29_s19 = sshll.u32 %s275_s1, 4  ;;  %s18_s16 = int_to_ptr.vmem [resolvable:$true] %s17_s16  ;;  %s30_s19 = int_to_ptr.hbm [resolvable:$true] %s29_s19 }
   0x4   :  { %s231_s20 = smov 128   ;;  %s232_s21 = smov 8  }
   0x5   :  { %23 = dma.hbm_to_vmem [thread:$0]  %s16_s14, 256, %s18_s16, [#allocation3], %s231_s20, %s231_s20, %s232_s21  }
   0x6   :  { %s233_s22 = smov [#allocation5]  }
   0x7   :  { %s31_s23 = sshll.u32 %s233_s22, 4  ;;  %s32_s23 = int_to_ptr.vmem [resolvable:$true] %s31_s23 }
   0x8   :  { %34 = dma.hbm_to_vmem [thread:$0]  %s30_s19, 16, %s32_s23, [#allocation6]  }
   0x9   :  { %224 = dma.done.wait [#allocation3], 256  }
   0xa   :  { %225 = vsyncadd [#allocation3], 4294967040 }
   0xb   :  { %226 = dma.done.wait [#allocation6], 16  }
   0xc   :  { %227 = vsyncadd [#allocation6], 4294967280  ;;  %vm47_vm0 = vcmask 261120   ;;  %v45_v0 = vld [vmem:[#allocation2] sm:$0xff]  ;;  %v46_v2 = vld [vmem:[#allocation2 + $0x8] sm:$0xff]  ;;  %v234_v4 = vmov 32.0  }
   0xd   :  { %v48_v1 = vsel %vm47_vm0, %v45_v0, 0.0  ;;  %v51_v3 = vsel %vm47_vm0, %v46_v2, 0.0  ;;  %146 = vrcp.f32 %v234_v4  ;;  %v144_v35 = vld [vmem:[#allocation5] ss:$0 sm:$0xff]  ;;  %v145_v38 = vld [vmem:[%s276_s2] ss:$0 sm:$0xff] }
   0xe   :  { %49 = vadd.xlane.f32.xlu0 %v48_v1  ;;  %vm113_vm7 = vcmask 257024   ;;  %s235_s24 = smov [#allocation7]   ;;  %s122_s2 = sshll.u32 %s277_s3, 4  ;;  %s123_s2 = int_to_ptr.hbm [resolvable:$true] %s122_s2 }
   0xf   :  { %s120_s25 = sshll.u32 %s235_s24, 4  ;;  %s236_s28 = smov 64   ;;  %s121_s25 = int_to_ptr.vmem [resolvable:$true] %s120_s25 }
  0x10   :  { %s237_s29 = smov 4  }
  0x13   :  { %v147_v5 = vpop.eup %146 }
  0x14   :  { %v55_v6 = vmul.f32 32.0, %v147_v5  ;;  %vm59_vm1 = vweird.f32 %v147_v5 }
  0x16   :  { %52 = vadd.xlane.f32.xlu0 %v51_v3  ;;  %v56_v7 = vsub.f32 1.0, %v55_v6 }
  0x18   :  { %v57_v8 = vmul.f32 %v147_v5, %v56_v7 }
  0x1a   :  { %v58_v9 = vadd.f32 %v147_v5, %v57_v8 }
  0x1c   :  { %v60_v10 = vsel %vm59_vm1, %v147_v5, %v58_v9 }
  0x81   :  { %v50_v11 = vpop.xlane.xlu0 %49 }
  0x82   :  { %v61_v12 = vmul.f32 %v60_v10, %v50_v11 }
  0x84   :  { %v63_v13 = vsub.f32 %v45_v0, %v61_v12 }
  0x86   :  { %v65_v14 = vmul.f32 %v63_v13, %v63_v13 }
  0x88   :  { %v67_v15 = vsel %vm47_vm0, %v65_v14, 0.0 }
  0x89   :  { %68 = vadd.xlane.f32.xlu1 %v67_v15  ;;  %v53_v16 = vpop.xlane.xlu0 %52 }
  0x8a   :  { %v62_v17 = vmul.f32 %v60_v10, %v53_v16 }
  0x8c   :  { %v64_v18 = vsub.f32 %v46_v2, %v62_v17 }
  0x8e   :  { %v66_v19 = vmul.f32 %v64_v18, %v64_v18 }
  0x90   :  { %v70_v20 = vsel %vm47_vm0, %v66_v19, 0.0 }
  0x91   :  { %71 = vadd.xlane.f32.xlu1 %v70_v20 }
  0xfc   :  { %v69_v21 = vpop.xlane.xlu1 %68 }
  0xfd   :  { %v73_v22 = vmul.f32 %v69_v21, %v60_v10 }
  0xff   :  { %v75_v23 = vadd.f32 1e-05, %v73_v22 }
 0x101   :  { %148 = vrsqrt.f32 %v75_v23  ;;  %vm83_vm3 = vweird.f32 %v75_v23 }
 0x104   :  { %v72_v24 = vpop.xlane.xlu1 %71 }
 0x105   :  { %v74_v25 = vmul.f32 %v72_v24, %v60_v10 }
 0x107   :  { %v149_v26 = vpop.eup %148  ;;  %v76_v27 = vadd.f32 1e-05, %v74_v25 }
 0x108   :  { %v78_v28 = vmul.f32 %v149_v26, %v75_v23  ;;  %vm84_vm2 = vweird.f32 %v149_v26 }
 0x109   :  { %150 = vrsqrt.f32 %v76_v27  ;;  %vm85_vm4 = vmor %vm83_vm3, %vm84_vm2  ;;  %vm93_vm6 = vweird.f32 %v76_v27 }
 0x10a   :  { %v79_v29 = vmul.f32 %v149_v26, %v78_v28 }
 0x10c   :  { %v80_v30 = vmul.f32 0.5, %v79_v29 }
 0x10e   :  { %v81_v31 = vsub.f32 1.5, %v80_v30 }
 0x10f   :  { %v151_v32 = vpop.eup %150 }
 0x110   :  { %v82_v33 = vmul.f32 %v149_v26, %v81_v31  ;;  %v88_v34 = vmul.f32 %v151_v32, %v76_v27  ;;  %vm94_vm5 = vweird.f32 %v151_v32 }
 0x111   :  { %vm95_vm8 = vmor %vm93_vm6, %vm94_vm5 }
 0x112   :  { %v86_v36 = vsel %vm85_vm4, %v149_v26, %v82_v33  ;;  %v89_v37 = vmul.f32 %v151_v32, %v88_v34 }
 0x113   :  { %v99_v39 = vmul.f32 %v86_v36, %v63_v13 }
 0x114   :  { %v90_v40 = vmul.f32 0.5, %v89_v37 }
 0x115   :  { %v104_v41 = vmul.f32 %v144_v35, %v99_v39 }
 0x116   :  { %v91_v42 = vsub.f32 1.5, %v90_v40 }
 0x117   :  { %v109_v43 = vadd.f32 %v145_v38, %v104_v41 }
 0x118   :  { %v92_v44 = vmul.f32 %v151_v32, %v91_v42 }
 0x119   :  { %v111_v45 = vpack.c.bf16 %v109_v43, %v109_v43 }
 0x11a   :  { %v96_v46 = vsel %vm95_vm8, %v151_v32, %v92_v44 }
 0x11b   :  { %v100_v47 = vmul.f32 %v96_v46, %v64_v18  ;;  %114 = vst.msk [vmem:[#allocation7] sm:$0xf] %vm113_vm7, %v111_v45 }
 0x11d   :  { %v105_v48 = vmul.f32 %v144_v35, %v100_v47 }
 0x11f   :  { %v110_v49 = vadd.f32 %v145_v38, %v105_v48 }
 0x121   :  { %v112_v50 = vpack.c.bf16 %v110_v49, %v110_v49 }
 0x123   :  { %115 = vst.msk [vmem:[#allocation7 + $0x4] sm:$0xf] %vm113_vm7, %v112_v50 }
 0x124   :  { %128 = dma.vmem_to_hbm [thread:$0]  %s121_s25, 128, %s123_s2, [#allocation4], %s236_s28, %s236_s28, %s237_s29  }
 0x125   :  { %228 = dma.done.wait [#allocation4], 128  }
 0x126   :  { %229 = vsyncadd [#allocation4], 4294967168 }
 0x127   :  { %133 = vsyncpa [#allocation3], 1 }
 0x128   :  { %134 = vsyncpa [#allocation6], 1 }
 0x129   :  { %135 = vsyncpa [#allocation4], 1 }

</bundles_post_ra>
